<compile_context>
chip_gen: v5e
topology: v5e:2x2
jax: 0.10.0
libtpu: 0.0.40
codegen_flags: <defaults>
</compile_context>

<pallas_src>
import jax
import jax.numpy as jnp
from jax.experimental import pallas as pl
from jax.experimental.pallas import tpu as pltpu

# Layer dims of AttackModel: fc1..fc5, stored as (fan_in, fan_out).
_LAYER_SIZES = [(10, 100), (100, 120), (120, 80), (80, 10), (10, 2)]
_PAD = 128                               # every in/out feature dim padded to 128 lanes
_NUM_LAYERS = len(_LAYER_SIZES)
_IN_FEATURES = _LAYER_SIZES[0][0]        # 10
_OUT_FEATURES = _LAYER_SIZES[-1][1]      # 2


def _round_up(n, m):
    return ((n + m - 1) // m) * m


# ----------------------------------------------------------------------------
# Kernel: one batch tile of the full 5-layer MLP.
#   x_ref: [TB, 10]    f32  (streamed batch tile)
#   w_ref: [640, 128]  f32  (5 zero-padded 128x128 weight blocks, VMEM-resident)
#   b_ref: [8, 128]    f32  (rows 0..4 = zero-padded biases, VMEM-resident)
#   o_ref: [TB, 128]   f32  (lane-dense output; cols 2..127 are zeros)
# ----------------------------------------------------------------------------
def _attack_mlp_kernel(x_ref, w_ref, b_ref, o_ref):
    # Layer 1: only the first 10 rows of the padded W1 block are meaningful.
    h = jnp.dot(x_ref[...], w_ref[0:_IN_FEATURES, :],
                preferred_element_type=jnp.float32) + b_ref[0:1, :]
    h = jnp.maximum(h, 0.0)                                   # [TB, 128]

    # Layers 2..4: padded 128x128 blocks; padded lanes of h are exactly 0.
    for layer in range(1, _NUM_LAYERS - 1):
        w = w_ref[layer * _PAD:(layer + 1) * _PAD, :]
        h = jnp.dot(h, w, preferred_element_type=jnp.float32) \
            + b_ref[layer:layer + 1, :]
        h = jnp.maximum(h, 0.0)

    # Layer 5: no ReLU. Full-width (unmasked) store; cols 2..127 are zero.
    w5 = w_ref[(_NUM_LAYERS - 1) * _PAD:_NUM_LAYERS * _PAD, :]
    o_ref[...] = jnp.dot(h, w5, preferred_element_type=jnp.float32) \
        + b_ref[_NUM_LAYERS - 1:_NUM_LAYERS, :]


# ----------------------------------------------------------------------------
# Parameter packing: 10 tiny arrays -> one weight slab + one bias slab.
# ----------------------------------------------------------------------------
def pack_params(params):
    w_slab = jnp.zeros((_NUM_LAYERS * _PAD, _PAD), jnp.float32)
    b_slab = jnp.zeros((8, _PAD), jnp.float32)
    for i, (fan_in, fan_out) in enumerate(_LAYER_SIZES):
        w_slab = w_slab.at[i * _PAD:i * _PAD + fan_in, :fan_out].set(
            params[f"w{i + 1}"])
        b_slab = b_slab.at[i, :fan_out].set(params[f"b{i + 1}"][0])
    return w_slab, b_slab


# ----------------------------------------------------------------------------
# Wrapper: batch-tiled pallas_call.
# ----------------------------------------------------------------------------
def attack_model_forward(x, w_slab, b_slab, *, tb=512):
    """x: [B, 10] f32 -> [B, 2] f32 logits."""
    B = x.shape[0]
    TB = min(tb, _round_up(max(B, 1), 8))       # batch tile (multiple of 8)
    Bp = _round_up(B, TB)
    xp = jnp.pad(x, ((0, Bp - B), (0, 0))) if Bp != B else x

    flops = 2 * B * sum(fi * fo for fi, fo in _LAYER_SIZES)
    bytes_accessed = (B * (_IN_FEATURES + _OUT_FEATURES)
                      + w_slab.size + b_slab.size) * 4

    out_padded = pl.pallas_call(
        _attack_mlp_kernel,
        out_shape=jax.ShapeDtypeStruct((Bp, _PAD), jnp.float32),
        grid_spec=pltpu.PrefetchScalarGridSpec(
            num_scalar_prefetch=0,
            grid=(Bp // TB,),
            in_specs=[
                # x tile: streamed / double-buffered per grid step.
                pl.BlockSpec((TB, _IN_FEATURES), lambda i: (i, 0)),
                # Weight + bias slabs: constant index_map -> fetched once,
                # resident in VMEM for the whole grid.
                pl.BlockSpec((_NUM_LAYERS * _PAD, _PAD), lambda i: (0, 0)),
                pl.BlockSpec((8, _PAD), lambda i: (0, 0)),
            ],
            out_specs=pl.BlockSpec((TB, _PAD), lambda i: (i, 0)),
        ),
        compiler_params=pltpu.CompilerParams(
            # Batch steps are independent -> shard across v7x's 2 TensorCores.
            dimension_semantics=("parallel",)),
        cost_estimate=pl.CostEstimate(
            flops=flops, transcendentals=0, bytes_accessed=bytes_accessed),
    )(xp, w_slab, b_slab)

    # Lane-dense [Bp, 128] store in-kernel; trivial slice back to [B, 2] here.
    return out_padded[:B, :_OUT_FEATURES]


# ----------------------------------------------------------------------------
# Deterministic parameter init (PyTorch nn.Linear default: U(+-1/sqrt(fan_in)))
# and a pure-JAX reference for correctness checking.
# ----------------------------------------------------------------------------
def init_params(key):
    params = {}
    for i, (fan_in, fan_out) in enumerate(_LAYER_SIZES, start=1):
        key, kw, kb = jax.random.split(key, 3)
        bound = 1.0 / jnp.sqrt(float(fan_in))
        params[f"w{i}"] = jax.random.uniform(
            kw, (fan_in, fan_out), jnp.float32, minval=-bound, maxval=bound)
        params[f"b{i}"] = jax.random.uniform(
            kb, (1, fan_out), jnp.float32, minval=-bound, maxval=bound)
    return params


def reference_forward(x, params):
    h = jax.nn.relu(x @ params["w1"] + params["b1"])
    h = jax.nn.relu(h @ params["w2"] + params["b2"])
    h = jax.nn.relu(h @ params["w3"] + params["b3"])
    h = jax.nn.relu(h @ params["w4"] + params["b4"])
    return h @ params["w5"] + params["b5"]


if __name__ == "__main__":
    key = jax.random.PRNGKey(0)
    key, kx, kx2 = jax.random.split(key, 3)
    params = init_params(key)
    w_slab, b_slab = pack_params(params)

    # Small batch (single grid step).
    B = 8
    x = jax.random.normal(kx, (B, 10), jnp.float32)
    out = jax.block_until_ready(attack_model_forward(x, w_slab, b_slab))
    ref = reference_forward(x, params)
    assert out.shape == (B, 2), out.shape
    assert jnp.allclose(out, ref, atol=1e-5, rtol=1e-5), "mismatch vs reference (B=8)"

    # Larger, ragged batch exercising the tiled grid + batch-padding path.
    B2 = 1000
    x2 = jax.random.normal(kx2, (B2, 10), jnp.float32)
    out2 = jax.block_until_ready(attack_model_forward(x2, w_slab, b_slab))
    ref2 = reference_forward(x2, params)
    assert out2.shape == (B2, 2), out2.shape
    assert jnp.allclose(out2, ref2, atol=1e-5, rtol=1e-5), "mismatch vs reference (B=1000)"

    print("KERNEL_OK")
</pallas_src>

<mosaic_0001>
module attributes {stable_mosaic.version = 11 : i64} {
  func.func @_attack_mlp_kernel(%arg0: i32, %arg1: memref<8x10xf32, #tpu.memory_space<vmem>>, %arg2: memref<640x128xf32, #tpu.memory_space<vmem>>, %arg3: memref<8x128xf32, #tpu.memory_space<vmem>>, %arg4: memref<8x128xf32, #tpu.memory_space<vmem>>) attributes {dimension_semantics = [#tpu.dimension_semantics<parallel>], iteration_bounds = array<i64: 1>, scalar_prefetch = 0 : i64, scratch_operands = 0 : i64, tpu.core_type = #tpu.core_type<tc>, window_params = [{transform_indices = @transform_0, window_bounds = array<i64: 8, 10>}, {pipeline_mode = #tpu.pipeline_mode<synchronous>, transform_indices = @transform_1, window_bounds = array<i64: 640, 128>}, {pipeline_mode = #tpu.pipeline_mode<synchronous>, transform_indices = @transform_2, window_bounds = array<i64: 8, 128>}, {transform_indices = @transform_3, window_bounds = array<i64: 8, 128>}]} {
    %c0 = arith.constant 0 : index
    %c0_0 = arith.constant 0 : index
    %0 = vector.load %arg1[%c0, %c0_0] : memref<8x10xf32, #tpu.memory_space<vmem>>, vector<8x10xf32>
    %c0_1 = arith.constant 0 : index
    %c0_2 = arith.constant 0 : index
    %1 = vector.load %arg2[%c0_1, %c0_2] : memref<640x128xf32, #tpu.memory_space<vmem>>, vector<10x128xf32>
    %cst = arith.constant dense<0.000000e+00> : vector<8x128xf32>
    %2 = tpu.matmul %0, %1, %cst {dimension_numbers = #tpu.dot_dimension_numbers<[1], [0], [0], [1], [0, 0, 1, 1], [], []>} : vector<8x10xf32>, vector<10x128xf32>, vector<8x128xf32> -> vector<8x128xf32>
    %c0_3 = arith.constant 0 : index
    %c0_4 = arith.constant 0 : index
    %3 = vector.load %arg3[%c0_3, %c0_4] : memref<8x128xf32, #tpu.memory_space<vmem>>, vector<1x128xf32>
    %4 = vector.broadcast %3 : vector<1x128xf32> to vector<8x128xf32>
    %5 = arith.addf %2, %4 : vector<8x128xf32>
    %cst_5 = arith.constant 0.000000e+00 : f32
    %6 = vector.broadcast %cst_5 : f32 to vector<8x128xf32>
    %7 = arith.maximumf %5, %6 : vector<8x128xf32>
    %c128 = arith.constant 128 : index
    %c0_6 = arith.constant 0 : index
    %8 = vector.load %arg2[%c128, %c0_6] : memref<640x128xf32, #tpu.memory_space<vmem>>, vector<128x128xf32>
    %cst_7 = arith.constant dense<0.000000e+00> : vector<8x128xf32>
    %9 = tpu.matmul %7, %8, %cst_7 {dimension_numbers = #tpu.dot_dimension_numbers<[1], [0], [0], [1], [0, 0, 1, 1], [], []>} : vector<8x128xf32>, vector<128x128xf32>, vector<8x128xf32> -> vector<8x128xf32>
    %c1 = arith.constant 1 : index
    %c0_8 = arith.constant 0 : index
    %10 = vector.load %arg3[%c1, %c0_8] : memref<8x128xf32, #tpu.memory_space<vmem>>, vector<1x128xf32>
    %11 = vector.broadcast %10 : vector<1x128xf32> to vector<8x128xf32>
    %12 = arith.addf %9, %11 : vector<8x128xf32>
    %cst_9 = arith.constant 0.000000e+00 : f32
    %13 = vector.broadcast %cst_9 : f32 to vector<8x128xf32>
    %14 = arith.maximumf %12, %13 : vector<8x128xf32>
    %c256 = arith.constant 256 : index
    %c0_10 = arith.constant 0 : index
    %15 = vector.load %arg2[%c256, %c0_10] : memref<640x128xf32, #tpu.memory_space<vmem>>, vector<128x128xf32>
    %cst_11 = arith.constant dense<0.000000e+00> : vector<8x128xf32>
    %16 = tpu.matmul %14, %15, %cst_11 {dimension_numbers = #tpu.dot_dimension_numbers<[1], [0], [0], [1], [0, 0, 1, 1], [], []>} : vector<8x128xf32>, vector<128x128xf32>, vector<8x128xf32> -> vector<8x128xf32>
    %c2 = arith.constant 2 : index
    %c0_12 = arith.constant 0 : index
    %17 = vector.load %arg3[%c2, %c0_12] : memref<8x128xf32, #tpu.memory_space<vmem>>, vector<1x128xf32>
    %18 = vector.broadcast %17 : vector<1x128xf32> to vector<8x128xf32>
    %19 = arith.addf %16, %18 : vector<8x128xf32>
    %cst_13 = arith.constant 0.000000e+00 : f32
    %20 = vector.broadcast %cst_13 : f32 to vector<8x128xf32>
    %21 = arith.maximumf %19, %20 : vector<8x128xf32>
    %c384 = arith.constant 384 : index
    %c0_14 = arith.constant 0 : index
    %22 = vector.load %arg2[%c384, %c0_14] : memref<640x128xf32, #tpu.memory_space<vmem>>, vector<128x128xf32>
    %cst_15 = arith.constant dense<0.000000e+00> : vector<8x128xf32>
    %23 = tpu.matmul %21, %22, %cst_15 {dimension_numbers = #tpu.dot_dimension_numbers<[1], [0], [0], [1], [0, 0, 1, 1], [], []>} : vector<8x128xf32>, vector<128x128xf32>, vector<8x128xf32> -> vector<8x128xf32>
    %c3 = arith.constant 3 : index
    %c0_16 = arith.constant 0 : index
    %24 = vector.load %arg3[%c3, %c0_16] : memref<8x128xf32, #tpu.memory_space<vmem>>, vector<1x128xf32>
    %25 = vector.broadcast %24 : vector<1x128xf32> to vector<8x128xf32>
    %26 = arith.addf %23, %25 : vector<8x128xf32>
    %cst_17 = arith.constant 0.000000e+00 : f32
    %27 = vector.broadcast %cst_17 : f32 to vector<8x128xf32>
    %28 = arith.maximumf %26, %27 : vector<8x128xf32>
    %c512 = arith.constant 512 : index
    %c0_18 = arith.constant 0 : index
    %29 = vector.load %arg2[%c512, %c0_18] : memref<640x128xf32, #tpu.memory_space<vmem>>, vector<128x128xf32>
    %cst_19 = arith.constant dense<0.000000e+00> : vector<8x128xf32>
    %30 = tpu.matmul %28, %29, %cst_19 {dimension_numbers = #tpu.dot_dimension_numbers<[1], [0], [0], [1], [0, 0, 1, 1], [], []>} : vector<8x128xf32>, vector<128x128xf32>, vector<8x128xf32> -> vector<8x128xf32>
    %c4 = arith.constant 4 : index
    %c0_20 = arith.constant 0 : index
    %31 = vector.load %arg3[%c4, %c0_20] : memref<8x128xf32, #tpu.memory_space<vmem>>, vector<1x128xf32>
    %32 = vector.broadcast %31 : vector<1x128xf32> to vector<8x128xf32>
    %33 = arith.addf %30, %32 : vector<8x128xf32>
    %c0_21 = arith.constant 0 : index
    %c0_22 = arith.constant 0 : index
    %34 = vector.load %arg4[%c0_21, %c0_22] : memref<8x128xf32, #tpu.memory_space<vmem>>, vector<8x128xf32>
    tpu.vector_store %arg4[%c0_21, %c0_22], %33 {strides = array<i32>} : memref<8x128xf32, #tpu.memory_space<vmem>>, vector<8x128xf32>,
    return
  }
  func.func @transform_0(%arg0: i32) -> (i32, i32) {
    %c0_i32 = arith.constant 0 : i32
    %c0_i32_0 = arith.constant 0 : i32
    return %arg0, %c0_i32 : i32, i32
  }
  func.func @transform_1(%arg0: i32) -> (i32, i32) {
    %c0_i32 = arith.constant 0 : i32
    %c0_i32_0 = arith.constant 0 : i32
    %c0_i32_1 = arith.constant 0 : i32
    return %c0_i32, %c0_i32_0 : i32, i32
  }
  func.func @transform_2(%arg0: i32) -> (i32, i32) {
    %c0_i32 = arith.constant 0 : i32
    %c0_i32_0 = arith.constant 0 : i32
    %c0_i32_1 = arith.constant 0 : i32
    return %c0_i32, %c0_i32_0 : i32, i32
  }
  func.func @transform_3(%arg0: i32) -> (i32, i32) {
    %c0_i32 = arith.constant 0 : i32
    %c0_i32_0 = arith.constant 0 : i32
    return %arg0, %c0_i32 : i32, i32
  }
}

</mosaic_0001>

<bundles_post_ra>
// kernel: tpu_custom_call.1
= control target key start
LH: loop header
LB: loop body
LE: loop exit
PB: predicated region body
PF: predicated region fallthrough
CT: control target
= control target key end

     0   :  { %8 = vsyncpa [#allocation3], 0  ;;  %s419_s0 = inlined_call_operand.hbm [shape: f32[8,10], index: 0, kind: input, shape index: {}]   ;;  %s420_s1 = inlined_call_operand.hbm [shape: f32[640,128], index: 1, kind: input, shape index: {}]   ;;  %s421_s2 = inlined_call_operand.hbm [shape: f32[8,128], index: 2, kind: input, shape index: {}]   ;;  %s422_s3 = inlined_call_operand.hbm [shape: f32[8,128], index: 3, kind: output, shape index: {}]  }
   0x1   :  { %9 = vsyncpa [#allocation6], 0  ;;  %s26_s14 = sshll.u32 %s420_s1, 4  ;;  %s27_s14 = int_to_ptr.hbm [resolvable:$true] %s26_s14 }
   0x2   :  { %10 = vsyncpa [#allocation4], 0  ;;  %s381_s15 = smov [#allocation5]   ;;  %s16_s19 = sshll.u32 %s419_s0, 4  ;;  %s17_s19 = int_to_ptr.hbm [resolvable:$true] %s16_s19 }
   0x3   :  { %s28_s16 = sshll.u32 %s381_s15, 4  ;;  %s382_s20 = smov 128   ;;  %s29_s16 = int_to_ptr.vmem [resolvable:$true] %s28_s16 }
   0x4   :  { %s383_s21 = smov 8   ;;  %s384_s22 = smov [#allocation2]  }
   0x5   :  { %34 = dma.hbm_to_vmem [thread:$0]  %s27_s14, 10240, %s29_s16, [#allocation6], %s382_s20, %s382_s20, %s383_s21  }
   0x6   :  { %s18_s23 = sshll.u32 %s384_s22, 4  ;;  %s40_s26 = sshll.u32 %s421_s2, 4  ;;  %s19_s23 = int_to_ptr.vmem [resolvable:$true] %s18_s23  ;;  %s41_s26 = int_to_ptr.hbm [resolvable:$true] %s40_s26 }
   0x7   :  { %21 = dma.hbm_to_vmem [thread:$0]  %s17_s19, 128, %s19_s23, [#allocation3]  }
   0x8   :  { %s385_s1 = smov [#allocation7]  }
   0x9   :  { %s42_s27 = sshll.u32 %s385_s1, 4  ;;  %s43_s27 = int_to_ptr.vmem [resolvable:$true] %s42_s27 }
   0xa   :  { %45 = dma.hbm_to_vmem [thread:$0]  %s41_s26, 128, %s43_s27, [#allocation6]  }
   0xb   :  { %375 = dma.done.wait [#allocation3], 128  }
   0xc   :  { %376 = vsyncadd [#allocation3], 4294967168 }
   0xd   :  { %377 = dma.done.wait [#allocation6], 10368  }
   0xe   :  { %378 = vsyncadd [#allocation6], 4294956928  ;;  %vm67_vm0 = vcmask 1041408   ;;  %v60_v0 = vld [vmem:[#allocation5 + $0x8] sm:$0x3]  ;;  %v59_v1 = vld [vmem:[#allocation5] sm:$0xff] }
   0xf   :  { %266 = vmatpush.msk.msra.mxu0 %vm67_vm0, %v60_v0  ;;  %v58_v2 = vld [vmem:[#allocation2] sm:$0xff]  ;;  %vm63_vm1 = vcmask 80896   ;;  %v106_v4 = vld [vmem:[#allocation5 + $0xf0] sm:$0xff]  ;;  %v105_v5 = vld [vmem:[#allocation5 + $0xe8] sm:$0xff]  ;;  %s386_s0 = smov [#allocation8]   ;;  %s255_s30 = sshll.u32 %s422_s3, 4  ;;  %s256_s30 = int_to_ptr.hbm [resolvable:$true] %s255_s30 }
  0x10   :  { %v107_v3 = vld [vmem:[#allocation5 + $0xf8] sm:$0xff]  ;;  %v104_v6 = vld [vmem:[#allocation5 + $0xe0] sm:$0xff]  ;;  %v102_v8 = vld [vmem:[#allocation5 + $0xd0] sm:$0xff]  ;;  %s253_s2 = sshll.u32 %s386_s0, 4  ;;  %s254_s2 = int_to_ptr.vmem [resolvable:$true] %s253_s2 }
  0x11   :  { %110 = vmatpush.msra.mxu1 %v107_v3  ;;  %86 = vmatpush.msra.mxu0 %v59_v1  ;;  %v103_v7 = vld [vmem:[#allocation5 + $0xd8] sm:$0xff]  ;;  %v101_v9 = vld [vmem:[#allocation5 + $0xc8] sm:$0xff]  ;;  %v100_v10 = vld [vmem:[#allocation5 + $0xc0] sm:$0xff] }
  0x12   :  { %267 = vmatmul.msk.f32.vlgmr.msra.gmra.mxu0 %vm63_vm1, %v58_v2  ;;  %v99_v11 = vld [vmem:[#allocation5 + $0xb8] sm:$0xff]  ;;  %v98_v12 = vld [vmem:[#allocation5 + $0xb0] sm:$0xff]  ;;  %v97_v13 = vld [vmem:[#allocation5 + $0xa8] sm:$0xff] }
  0x13   :  { %111 = vmatpush.msra.mxu1 %v106_v4  ;;  %v96_v14 = vld [vmem:[#allocation5 + $0xa0] sm:$0xff]  ;;  %v95_v15 = vld [vmem:[#allocation5 + $0x98] sm:$0xff]  ;;  %v94_v16 = vld [vmem:[#allocation5 + $0x90] sm:$0xff] }
  0x14   :  { %v93_v17 = vld [vmem:[#allocation5 + $0x88] sm:$0xff]  ;;  %v92_v18 = vld [vmem:[#allocation5 + $0x80] sm:$0xff]  ;;  %v146_v19 = vld [vmem:[#allocation5 + $0x178] sm:$0xff] }
  0x15   :  { %112 = vmatpush.msra.mxu1 %v105_v5  ;;  %v145_v20 = vld [vmem:[#allocation5 + $0x170] sm:$0xff]  ;;  %149 = vmatpush.msra.mxu2 %v146_v19  ;;  %v144_v21 = vld [vmem:[#allocation5 + $0x168] sm:$0xff]  ;;  %v143_v22 = vld [vmem:[#allocation5 + $0x160] sm:$0xff] }
  0x16   :  { %v142_v23 = vld [vmem:[#allocation5 + $0x158] sm:$0xff]  ;;  %v141_v24 = vld [vmem:[#allocation5 + $0x150] sm:$0xff]  ;;  %v140_v25 = vld [vmem:[#allocation5 + $0x148] sm:$0xff] }
  0x17   :  { %113 = vmatpush.msra.mxu1 %v104_v6  ;;  %150 = vmatpush.msra.mxu2 %v145_v20  ;;  %v139_v26 = vld [vmem:[#allocation5 + $0x140] sm:$0xff]  ;;  %v138_v27 = vld [vmem:[#allocation5 + $0x138] sm:$0xff]  ;;  %v137_v28 = vld [vmem:[#allocation5 + $0x130] sm:$0xff] }
  0x18   :  { %v136_v29 = vld [vmem:[#allocation5 + $0x128] sm:$0xff]  ;;  %v135_v30 = vld [vmem:[#allocation5 + $0x120] sm:$0xff]  ;;  %v134_v31 = vld [vmem:[#allocation5 + $0x118] sm:$0xff] }
  0x19   :  { %114 = vmatpush.msra.mxu1 %v103_v7  ;;  %151 = vmatpush.msra.mxu2 %v144_v21  ;;  %v274_v32 = vld [vmem:[#allocation7] ss:$0 sm:$0xff]  ;;  %v133_v36 = vld [vmem:[#allocation5 + $0x110] sm:$0xff]  ;;  %v132_v37 = vld [vmem:[#allocation5 + $0x108] sm:$0xff] }
  0x1a   :  { %v131_v38 = vld [vmem:[#allocation5 + $0x100] sm:$0xff]  ;;  %v185_v39 = vld [vmem:[#allocation5 + $0x1f8] sm:$0xff]  ;;  %v184_v40 = vld [vmem:[#allocation5 + $0x1f0] sm:$0xff] }
  0x1b   :  { %115 = vmatpush.msra.mxu1 %v102_v8  ;;  %152 = vmatpush.msra.mxu2 %v143_v22  ;;  %v183_v41 = vld [vmem:[#allocation5 + $0x1e8] sm:$0xff]  ;;  %v182_v42 = vld [vmem:[#allocation5 + $0x1e0] sm:$0xff]  ;;  %v181_v43 = vld [vmem:[#allocation5 + $0x1d8] sm:$0xff] }
  0x1c   :  { %188 = vmatpush.msra.mxu3 %v185_v39  ;;  %v180_v44 = vld [vmem:[#allocation5 + $0x1d0] sm:$0xff]  ;;  %v179_v45 = vld [vmem:[#allocation5 + $0x1c8] sm:$0xff]  ;;  %v178_v46 = vld [vmem:[#allocation5 + $0x1c0] sm:$0xff] }
  0x1d   :  { %116 = vmatpush.msra.mxu1 %v101_v9  ;;  %153 = vmatpush.msra.mxu2 %v142_v23  ;;  %v177_v47 = vld [vmem:[#allocation5 + $0x1b8] sm:$0xff]  ;;  %v176_v48 = vld [vmem:[#allocation5 + $0x1b0] sm:$0xff]  ;;  %v175_v49 = vld [vmem:[#allocation5 + $0x1a8] sm:$0xff] }
  0x1e   :  { %189 = vmatpush.msra.mxu3 %v184_v40  ;;  %v174_v50 = vld [vmem:[#allocation5 + $0x1a0] sm:$0xff]  ;;  %v173_v51 = vld [vmem:[#allocation5 + $0x198] sm:$0xff]  ;;  %v172_v56 = vld [vmem:[#allocation5 + $0x190] sm:$0xff] }
  0x1f   :  { %117 = vmatpush.msra.mxu1 %v100_v10  ;;  %154 = vmatpush.msra.mxu2 %v141_v24  ;;  %v275_v52 = vld [vmem:[#allocation7 + $0x1] ss:$0 sm:$0xff]  ;;  %v171_v57 = vld [vmem:[#allocation5 + $0x188] sm:$0xff]  ;;  %v224_v59 = vld [vmem:[#allocation5 + $0x278] sm:$0xff] }
  0x20   :  { %190 = vmatpush.msra.mxu3 %v183_v41  ;;  %v170_v58 = vld [vmem:[#allocation5 + $0x180] sm:$0xff]  ;;  %v223_v60 = vld [vmem:[#allocation5 + $0x270] sm:$0xff]  ;;  %227 = vmatpush.msrb.mxu0 %v224_v59  ;;  %v222_v61 = vld [vmem:[#allocation5 + $0x268] sm:$0xff] }
  0x21   :  { %118 = vmatpush.msra.mxu1 %v99_v11  ;;  %155 = vmatpush.msra.mxu2 %v140_v25  ;;  %v221_v62 = vld [vmem:[#allocation5 + $0x260] sm:$0xff]  ;;  %v220_v63 = vld [vmem:[#allocation5 + $0x258] sm:$0xff]  ;;  %v219_v0 = vld [vmem:[#allocation5 + $0x250] sm:$0xff] }
  0x22   :  { %191 = vmatpush.msra.mxu3 %v182_v42  ;;  %228 = vmatpush.msrb.mxu0 %v223_v60  ;;  %v218_v1 = vld [vmem:[#allocation5 + $0x248] sm:$0xff]  ;;  %v217_v2 = vld [vmem:[#allocation5 + $0x240] sm:$0xff]  ;;  %v216_v3 = vld [vmem:[#allocation5 + $0x238] sm:$0xff] }
  0x23   :  { %119 = vmatpush.msra.mxu1 %v98_v12  ;;  %156 = vmatpush.msra.mxu2 %v139_v26  ;;  %v215_v4 = vld [vmem:[#allocation5 + $0x230] sm:$0xff]  ;;  %v214_v5 = vld [vmem:[#allocation5 + $0x228] sm:$0xff]  ;;  %v213_v6 = vld [vmem:[#allocation5 + $0x220] sm:$0xff] }
  0x24   :  { %192 = vmatpush.msra.mxu3 %v181_v43  ;;  %229 = vmatpush.msrb.mxu0 %v222_v61  ;;  %v212_v7 = vld [vmem:[#allocation5 + $0x218] sm:$0xff]  ;;  %v276_v8 = vld [vmem:[#allocation7 + $0x2] ss:$0 sm:$0xff]  ;;  %v211_v12 = vld [vmem:[#allocation5 + $0x210] sm:$0xff] }
  0x25   :  { %120 = vmatpush.msra.mxu1 %v97_v13  ;;  %157 = vmatpush.msra.mxu2 %v138_v27  ;;  %v210_v13 = vld [vmem:[#allocation5 + $0x208] sm:$0xff]  ;;  %v278_v19 = vld [vmem:[#allocation7 + $0x4] ss:$0 sm:$0xff] }
  0x26   :  { %193 = vmatpush.msra.mxu3 %v180_v44  ;;  %230 = vmatpush.msrb.mxu0 %v221_v62 }
  0x27   :  { %121 = vmatpush.msra.mxu1 %v96_v14  ;;  %158 = vmatpush.msra.mxu2 %v137_v28  ;;  %v209_v14 = vld [vmem:[#allocation5 + $0x200] sm:$0xff] }
  0x28   :  { %194 = vmatpush.msra.mxu3 %v179_v45  ;;  %231 = vmatpush.msrb.mxu0 %v220_v63 }
  0x29   :  { %122 = vmatpush.msra.mxu1 %v95_v15  ;;  %159 = vmatpush.msra.mxu2 %v136_v29  ;;  %v277_v15 = vld [vmem:[#allocation7 + $0x3] ss:$0 sm:$0xff] }
  0x2a   :  { %195 = vmatpush.msra.mxu3 %v178_v46  ;;  %232 = vmatpush.msrb.mxu0 %v219_v0 }
  0x2b   :  { %123 = vmatpush.msra.mxu1 %v94_v16  ;;  %160 = vmatpush.msra.mxu2 %v135_v30 }
  0x2c   :  { %196 = vmatpush.msra.mxu3 %v177_v47  ;;  %233 = vmatpush.msrb.mxu0 %v218_v1 }
  0x2d   :  { %124 = vmatpush.msra.mxu1 %v93_v17  ;;  %161 = vmatpush.msra.mxu2 %v134_v31 }
  0x2e   :  { %197 = vmatpush.msra.mxu3 %v176_v48  ;;  %234 = vmatpush.msrb.mxu0 %v217_v2 }
  0x2f   :  { %125 = vmatpush.msra.mxu1 %v92_v18  ;;  %162 = vmatpush.msra.mxu2 %v133_v36 }
  0x30   :  { %198 = vmatpush.msra.mxu3 %v175_v49  ;;  %235 = vmatpush.msrb.mxu0 %v216_v3 }
  0x31   :  { %163 = vmatpush.msra.mxu2 %v132_v37 }
  0x32   :  { %199 = vmatpush.msra.mxu3 %v174_v50  ;;  %236 = vmatpush.msrb.mxu0 %v215_v4 }
  0x33   :  { %164 = vmatpush.msra.mxu2 %v131_v38 }
  0x34   :  { %200 = vmatpush.msra.mxu3 %v173_v51  ;;  %237 = vmatpush.msrb.mxu0 %v214_v5 }
  0x36   :  { %201 = vmatpush.msra.mxu3 %v172_v56  ;;  %238 = vmatpush.msrb.mxu0 %v213_v6 }
  0x38   :  { %202 = vmatpush.msra.mxu3 %v171_v57  ;;  %239 = vmatpush.msrb.mxu0 %v212_v7 }
  0x3a   :  { %203 = vmatpush.msra.mxu3 %v170_v58  ;;  %240 = vmatpush.msrb.mxu0 %v211_v12 }
  0x3c   :  { %241 = vmatpush.msrb.mxu0 %v210_v13 }
  0x3e   :  { %242 = vmatpush.msrb.mxu0 %v209_v14 }
  0x8f   :  { %v88_v33 = vpop.f32.mrf.mxu0 }
  0x90   :  { %v89_v34 = vadd.f32 %v274_v32, %v88_v33 }
  0x92   :  { %v91_v35 = vmax.f32 %v89_v34, 0.0 }
  0x94   :  { %126 = vmatmul.f32.vlgmr.msra.gmra.mxu1 %v91_v35 }
 0x111   :  { %v127_v53 = vpop.f32.mrf.mxu1 }
 0x112   :  { %v128_v54 = vadd.f32 %v275_v52, %v127_v53 }
 0x114   :  { %v130_v55 = vmax.f32 %v128_v54, 0.0 }
 0x116   :  { %165 = vmatmul.f32.vlgmr.msra.gmra.mxu2 %v130_v55 }
 0x199   :  { %v166_v9 = vpop.f32.mrf.mxu2 }
 0x19a   :  { %v167_v10 = vadd.f32 %v276_v8, %v166_v9 }
 0x19c   :  { %v169_v11 = vmax.f32 %v167_v10, 0.0 }
 0x19e   :  { %204 = vmatmul.f32.vlgmr.msra.gmra.mxu3 %v169_v11 }
 0x221   :  { %v205_v16 = vpop.f32.mrf.mxu3 }
 0x222   :  { %v206_v17 = vadd.f32 %v277_v15, %v205_v16 }
 0x224   :  { %v208_v18 = vmax.f32 %v206_v17, 0.0 }
 0x226   :  { %243 = vmatmul.f32.vlgmr.msrb.gmra.mxu0 %v208_v18 }
 0x2a3   :  { %v244_v20 = vpop.f32.mrf.mxu0 }
 0x2a4   :  { %v245_v21 = vadd.f32 %v278_v19, %v244_v20 }
 0x2a6   :  { %247 = vst [vmem:[#allocation8] sm:$0xff] %v245_v21 }
 0x2a7   :  { %258 = dma.vmem_to_hbm [thread:$0]  %s254_s2, 128, %s256_s30, [#allocation4]  }
 0x2a8   :  { %379 = dma.done.wait [#allocation4], 128  }
 0x2a9   :  { %380 = vsyncadd [#allocation4], 4294967168 }
 0x2aa   :  { %263 = vsyncpa [#allocation3], 1 }
 0x2ab   :  { %264 = vsyncpa [#allocation6], 1 }
 0x2ac   :  { %265 = vsyncpa [#allocation4], 1 }

</bundles_post_ra>
